<compile_context>
chip_gen: v7x
topology: tpu7x:2x2x1
jax: 0.10.0
libtpu: 0.0.40
codegen_flags: <defaults>
</compile_context>

<pallas_src>
import functools
from typing import NamedTuple

import jax
import jax.numpy as jnp
from jax.experimental import pallas as pl
from jax.experimental.pallas import tpu as pltpu


def _round_up(x, m):
    return (x + m - 1) // m * m


class MLPParams(NamedTuple):
    w_t: jax.Array    # [k_pad, n_pad]  (in_dim padded iff K-tiled; out_dim padded to 128 lanes)
    b: jax.Array      # [1, n_pad] f32
    gamma: jax.Array  # [1, n_pad] f32
    beta: jax.Array   # [1, n_pad] f32
    in_dim: int
    out_dim: int
    k_tile: int       # 0 => W kept VMEM-resident; else K-grid tile size (multiple of 128)


# Above this many bytes of padded W we stream W with a K-tiled accumulator grid instead of
# keeping it VMEM-resident (matters on v7x: 64 MiB VMEM/TC, 32 MiB default scoped limit).
_W_RESIDENT_BUDGET_BYTES = 24 << 20


def prepare_params(w_t, b, gamma, beta, *, param_dtype=None,
                   w_resident_budget_bytes=_W_RESIDENT_BUDGET_BYTES, k_tile=128):
    """One-time parameter prep (hoisted out of the per-call hot path).

    w_t: [in_dim, out_dim] (transposed torch Linear weight); b/gamma/beta: [out_dim] or [1, out_dim].
    param_dtype: e.g. jnp.bfloat16 to feed the MXU its fast path (f32 accumulation stays in-kernel).
    """
    in_dim, out_dim = w_t.shape
    if param_dtype is not None:
        w_t = w_t.astype(param_dtype)
    n_pad = _round_up(out_dim, 128)                         # lane-dense output width
    k_tiled = w_t.dtype.itemsize * in_dim * n_pad > w_resident_budget_bytes
    k_pad = _round_up(in_dim, k_tile) if k_tiled else in_dim

    b, gamma, beta = (jnp.asarray(a, dtype=jnp.float32).reshape(1, -1)
                      for a in (b, gamma, beta))
    if n_pad != out_dim:
        cpad = ((0, 0), (0, n_pad - out_dim))
        b, gamma, beta = jnp.pad(b, cpad), jnp.pad(gamma, cpad), jnp.pad(beta, cpad)
    if k_pad != in_dim or n_pad != out_dim:
        w_t = jnp.pad(w_t, ((0, k_pad - in_dim), (0, n_pad - out_dim)))
    return MLPParams(w_t=w_t, b=b, gamma=gamma, beta=beta,
                     in_dim=in_dim, out_dim=out_dim,
                     k_tile=(k_tile if k_tiled else 0))


def _ln_leakyrelu(h, gamma, beta, *, out_dim, n_pad_minus, eps, neg_slope):
    """LayerNorm(out_dim) + LeakyReLU on an f32 tile [tm, n_pad].

    Padded columns of h are exactly zero (zero-padded W / bias), so sum(h) needs no mask.
    Variance uses a per-row scalar correction for the (n_pad - out_dim) padded columns of
    (h - mean): no iota, no full-tile mask multiplies.
    """
    inv_n = jnp.float32(1.0 / out_dim)
    mean = jnp.sum(h, axis=-1, keepdims=True) * inv_n
    cent = h - mean
    ssq = jnp.sum(cent * cent, axis=-1, keepdims=True)
    if n_pad_minus:                                         # static compile-time int
        ssq = ssq - jnp.float32(n_pad_minus) * (mean * mean)
    var = jnp.maximum(ssq * inv_n, 0.0)
    hn = cent * jax.lax.rsqrt(var + jnp.float32(eps))
    hn = hn * gamma + beta
    # LeakyReLU via mul+max (2 VALU ops) instead of cmp+mul+select (3 ops).
    return jnp.maximum(hn, jnp.float32(neg_slope) * hn)


def _mlp_resident_kernel(x_ref, w_ref, b_ref, g_ref, bt_ref, o_ref, *,
                         out_dim, n_pad_minus, eps, neg_slope):
    h = jnp.dot(x_ref[...], w_ref[...], preferred_element_type=jnp.float32)
    h = h + b_ref[...].astype(jnp.float32)
    y = _ln_leakyrelu(h, g_ref[...].astype(jnp.float32), bt_ref[...].astype(jnp.float32),
                      out_dim=out_dim, n_pad_minus=n_pad_minus, eps=eps, neg_slope=neg_slope)
    # Dropout: identity (inference).
    o_ref[...] = y.astype(o_ref.dtype)


def _mlp_ktiled_kernel(x_ref, w_ref, b_ref, g_ref, bt_ref, o_ref, acc_ref, *,
                       out_dim, n_pad_minus, eps, neg_slope):
    k = pl.program_id(1)

    @pl.when(k == 0)
    def _():
        acc_ref[...] = jnp.zeros_like(acc_ref)

    acc_ref[...] += jnp.dot(x_ref[...], w_ref[...], preferred_element_type=jnp.float32)

    @pl.when(k == pl.num_programs(1) - 1)
    def _():
        h = acc_ref[...] + b_ref[...].astype(jnp.float32)
        y = _ln_leakyrelu(h, g_ref[...].astype(jnp.float32), bt_ref[...].astype(jnp.float32),
                          out_dim=out_dim, n_pad_minus=n_pad_minus, eps=eps, neg_slope=neg_slope)
        o_ref[...] = y.astype(o_ref.dtype)


def mlp_block(x, params: MLPParams, *, block_m=512, out_dtype=jnp.float32,
              eps=1e-5, neg_slope=0.1):
    """x: [B, in_dim] -> [B, out_dim]  (Linear -> LayerNorm -> LeakyReLU(0.1) -> Dropout[eval])."""
    B, in_dim = x.shape
    if in_dim != params.in_dim:
        raise ValueError(f"x in_dim {in_dim} != params in_dim {params.in_dim}")
    k_pad, n_pad = params.w_t.shape
    out_dim = params.out_dim
    n_pad_minus = n_pad - out_dim

    # Feed the MXU in the weights' dtype (bf16 fast path if params were prepared in bf16);
    # accumulation stays f32 via preferred_element_type.
    if x.dtype != params.w_t.dtype:
        x = x.astype(params.w_t.dtype)

    # Adaptive batch tiling: near-even row split, tile is a multiple of 8, minimal pad waste.
    b8 = _round_up(B, 8)
    n_row_tiles = -(-b8 // block_m)
    tm = _round_up(-(-b8 // n_row_tiles), 8)
    b_pad = n_row_tiles * tm

    if (b_pad - B) or (k_pad - in_dim):
        x = jnp.pad(x, ((0, b_pad - B), (0, k_pad - in_dim)))

    kern_kwargs = dict(out_dim=out_dim, n_pad_minus=n_pad_minus, eps=eps, neg_slope=neg_slope)
    x_item = x.dtype.itemsize
    w_item = params.w_t.dtype.itemsize
    o_item = jnp.dtype(out_dtype).itemsize

    def run(single_buffer):
        # Grid-invariant operands are fetched once; single-buffer them to halve their VMEM.
        pm = {"pipeline_mode": pl.Buffered(1)} if single_buffer else {}

        def vec_spec():
            return pl.BlockSpec((1, n_pad), lambda *_: (0, 0), **pm)

        if params.k_tile:
            # Stream W in K slabs with an f32 accumulator (W too big to keep VMEM-resident).
            tk = params.k_tile
            grid = (n_row_tiles, k_pad // tk)
            in_specs = [
                pl.BlockSpec((tm, tk), lambda i, k: (i, k)),            # x slab, streamed
                pl.BlockSpec((tk, n_pad), lambda i, k: (k, 0)),         # W slab, double-buffered
                vec_spec(), vec_spec(), vec_spec(),
            ]
            out_spec = pl.BlockSpec((tm, n_pad), lambda i, k: (i, 0))
            scratch = [pltpu.VMEM((tm, n_pad), jnp.float32)]
            kern = functools.partial(_mlp_ktiled_kernel, **kern_kwargs)
            dims = ("parallel", "arbitrary")
            vmem_needed = (2 * tm * tk * x_item + 2 * tk * n_pad * w_item
                           + 2 * tm * n_pad * o_item + tm * n_pad * 4 + 6 * n_pad * 4)
        else:
            grid = (n_row_tiles,)
            in_specs = [
                pl.BlockSpec((tm, k_pad), lambda i: (i, 0)),            # x tile, streamed
                pl.BlockSpec((k_pad, n_pad), lambda *_: (0, 0), **pm),  # W VMEM-resident
                vec_spec(), vec_spec(), vec_spec(),
            ]
            out_spec = pl.BlockSpec((tm, n_pad), lambda i: (i, 0))
            scratch = []
            kern = functools.partial(_mlp_resident_kernel, **kern_kwargs)
            dims = ("parallel",)
            w_bufs = 1 if single_buffer else 2
            vmem_needed = (2 * tm * k_pad * x_item + w_bufs * k_pad * n_pad * w_item
                           + 2 * tm * n_pad * o_item + 6 * n_pad * 4)

        vmem_limit = min(max(int(vmem_needed * 1.25) + (4 << 20), 32 << 20), 100 << 20)

        return pl.pallas_call(
            kern,
            out_shape=jax.ShapeDtypeStruct((b_pad, n_pad), out_dtype),
            grid_spec=pltpu.PrefetchScalarGridSpec(
                num_scalar_prefetch=0,
                grid=grid,
                in_specs=in_specs,
                out_specs=out_spec,
                scratch_shapes=scratch,
            ),
            compiler_params=pltpu.CompilerParams(
                dimension_semantics=dims,
                vmem_limit_bytes=vmem_limit),
        )(x, params.w_t, params.b, params.gamma, params.beta)

    try:
        out = run(single_buffer=True)
    except Exception:
        # pl.Buffered(1) pipeline_mode rejected on this JAX build: fall back to default pipelining.
        out = run(single_buffer=False)

    return out[:B, :out_dim]


def _reference(x, w_t, b, gamma, beta, eps=1e-5, neg_slope=0.1):
    h = jnp.dot(x, w_t, preferred_element_type=jnp.float32) + b
    mu = jnp.mean(h, axis=-1, keepdims=True)
    var = jnp.mean((h - mu) ** 2, axis=-1, keepdims=True)
    hn = (h - mu) / jnp.sqrt(var + eps) * gamma + beta
    return jnp.where(hn >= 0, hn, neg_slope * hn)


if __name__ == "__main__":
    key = jax.random.PRNGKey(0)
    k1, k2, k3, k4, k5, k6, k7, k8 = jax.random.split(key, 8)

    # ---- Case 1: MLPBlock(in_dim=16, out_dim=32), batch 8, f32, W-resident path ----
    B, in_dim, out_dim = 8, 16, 32
    x = jax.random.normal(k1, (B, in_dim), dtype=jnp.float32)
    bound = 1.0 / jnp.sqrt(jnp.float32(in_dim))
    w = jax.random.uniform(k2, (out_dim, in_dim), minval=-bound, maxval=bound, dtype=jnp.float32)
    b = jax.random.uniform(k3, (1, out_dim), minval=-bound, maxval=bound, dtype=jnp.float32)
    gamma = jnp.ones((1, out_dim), jnp.float32)
    beta = jnp.zeros((1, out_dim), jnp.float32)

    params = prepare_params(w.T, b, gamma, beta)        # one-time pad, outside the hot path
    out = mlp_block(x, params)
    jax.block_until_ready(out)
    ref = _reference(x, w.T, b, gamma, beta)
    assert out.shape == (B, out_dim)
    assert jnp.allclose(out, ref, atol=1e-5, rtol=1e-5), "f32 W-resident path mismatch"

    # ---- Case 2: bf16 weights, K-tiled accumulator path (forced), bf16 output ----
    B2, in2, out2 = 64, 256, 128
    x2 = jax.random.normal(k4, (B2, in2), dtype=jnp.float32)
    bound2 = 1.0 / jnp.sqrt(jnp.float32(in2))
    w2 = jax.random.uniform(k5, (out2, in2), minval=-bound2, maxval=bound2, dtype=jnp.float32)
    b2 = jax.random.uniform(k6, (1, out2), minval=-bound2, maxval=bound2, dtype=jnp.float32)
    gamma2 = jax.random.uniform(k7, (1, out2), minval=0.5, maxval=1.5, dtype=jnp.float32)
    beta2 = 0.1 * jax.random.normal(k8, (1, out2), dtype=jnp.float32)

    params2 = prepare_params(w2.T, b2, gamma2, beta2, param_dtype=jnp.bfloat16,
                             w_resident_budget_bytes=1)  # force K-tiled streaming path
    out2_arr = mlp_block(x2, params2, out_dtype=jnp.bfloat16)
    jax.block_until_ready(out2_arr)
    ref2 = _reference(x2.astype(jnp.bfloat16), w2.T.astype(jnp.bfloat16), b2, gamma2, beta2)
    assert out2_arr.shape == (B2, out2)
    assert jnp.allclose(out2_arr.astype(jnp.float32), ref2, atol=5e-2, rtol=5e-2), \
        "bf16 K-tiled path mismatch"

    print("KERNEL_OK")
</pallas_src>

<mosaic_0001>
module attributes {stable_mosaic.version = 11 : i64} {
  func.func @_mlp_resident_kernel(%arg0: i32, %arg1: memref<8x16xf32, #tpu.memory_space<vmem>>, %arg2: memref<16x128xf32, #tpu.memory_space<vmem>>, %arg3: memref<1x128xf32, #tpu.memory_space<vmem>>, %arg4: memref<1x128xf32, #tpu.memory_space<vmem>>, %arg5: memref<1x128xf32, #tpu.memory_space<vmem>>, %arg6: memref<8x128xf32, #tpu.memory_space<vmem>>) attributes {dimension_semantics = [#tpu.dimension_semantics<parallel>], iteration_bounds = array<i64: 1>, scalar_prefetch = 0 : i64, scratch_operands = 0 : i64, tpu.core_type = #tpu.core_type<tc>, window_params = [{transform_indices = @transform_0, window_bounds = array<i64: 8, 16>}, {pipeline_mode = #tpu.pipeline_mode<synchronous>, transform_indices = @transform_1, window_bounds = array<i64: 16, 128>}, {pipeline_mode = #tpu.pipeline_mode<synchronous>, transform_indices = @transform_2, window_bounds = array<i64: 1, 128>}, {pipeline_mode = #tpu.pipeline_mode<synchronous>, transform_indices = @transform_3, window_bounds = array<i64: 1, 128>}, {pipeline_mode = #tpu.pipeline_mode<synchronous>, transform_indices = @transform_4, window_bounds = array<i64: 1, 128>}, {transform_indices = @transform_5, window_bounds = array<i64: 8, 128>}]} {
    %c0 = arith.constant 0 : index
    %c0_0 = arith.constant 0 : index
    %0 = vector.load %arg1[%c0, %c0_0] : memref<8x16xf32, #tpu.memory_space<vmem>>, vector<8x16xf32>
    %c0_1 = arith.constant 0 : index
    %c0_2 = arith.constant 0 : index
    %1 = vector.load %arg2[%c0_1, %c0_2] : memref<16x128xf32, #tpu.memory_space<vmem>>, vector<16x128xf32>
    %cst = arith.constant dense<0.000000e+00> : vector<8x128xf32>
    %2 = tpu.matmul %0, %1, %cst {dimension_numbers = #tpu.dot_dimension_numbers<[1], [0], [0], [1], [0, 0, 1, 1], [], []>} : vector<8x16xf32>, vector<16x128xf32>, vector<8x128xf32> -> vector<8x128xf32>
    %c0_3 = arith.constant 0 : index
    %c0_4 = arith.constant 0 : index
    %3 = vector.load %arg3[%c0_3, %c0_4] : memref<1x128xf32, #tpu.memory_space<vmem>>, vector<1x128xf32>
    %4 = vector.broadcast %3 : vector<1x128xf32> to vector<8x128xf32>
    %5 = arith.addf %2, %4 : vector<8x128xf32>
    %c0_5 = arith.constant 0 : index
    %c0_6 = arith.constant 0 : index
    %6 = vector.load %arg4[%c0_5, %c0_6] : memref<1x128xf32, #tpu.memory_space<vmem>>, vector<1x128xf32>
    %c0_7 = arith.constant 0 : index
    %c0_8 = arith.constant 0 : index
    %7 = vector.load %arg5[%c0_7, %c0_8] : memref<1x128xf32, #tpu.memory_space<vmem>>, vector<1x128xf32>
    %cst_9 = arith.constant dense<0.000000e+00> : vector<8xf32>
    %8 = vector.multi_reduction <add>, %5, %cst_9 [1] : vector<8x128xf32> to vector<8xf32>
    %9 = vector.shape_cast %8 : vector<8xf32> to vector<8x1xf32>
    %cst_10 = arith.constant 3.125000e-02 : f32
    %10 = vector.broadcast %cst_10 : f32 to vector<8x1xf32>
    %11 = arith.mulf %9, %10 : vector<8x1xf32>
    %12 = vector.broadcast %11 : vector<8x1xf32> to vector<8x128xf32>
    %13 = arith.subf %5, %12 : vector<8x128xf32>
    %14 = arith.mulf %13, %13 : vector<8x128xf32>
    %cst_11 = arith.constant dense<0.000000e+00> : vector<8xf32>
    %15 = vector.multi_reduction <add>, %14, %cst_11 [1] : vector<8x128xf32> to vector<8xf32>
    %16 = vector.shape_cast %15 : vector<8xf32> to vector<8x1xf32>
    %17 = arith.mulf %11, %11 : vector<8x1xf32>
    %cst_12 = arith.constant 9.600000e+01 : f32
    %18 = vector.broadcast %cst_12 : f32 to vector<8x1xf32>
    %19 = arith.mulf %18, %17 : vector<8x1xf32>
    %20 = arith.subf %16, %19 : vector<8x1xf32>
    %cst_13 = arith.constant 3.125000e-02 : f32
    %21 = vector.broadcast %cst_13 : f32 to vector<8x1xf32>
    %22 = arith.mulf %20, %21 : vector<8x1xf32>
    %cst_14 = arith.constant 0.000000e+00 : f32
    %23 = vector.broadcast %cst_14 : f32 to vector<8x1xf32>
    %24 = arith.maximumf %22, %23 : vector<8x1xf32>
    %cst_15 = arith.constant 9.99999974E-6 : f32
    %25 = vector.broadcast %cst_15 : f32 to vector<8x1xf32>
    %26 = arith.addf %24, %25 : vector<8x1xf32>
    %27 = math.rsqrt %26 : vector<8x1xf32>
    %28 = vector.broadcast %27 : vector<8x1xf32> to vector<8x128xf32>
    %29 = arith.mulf %13, %28 : vector<8x128xf32>
    %30 = vector.broadcast %6 : vector<1x128xf32> to vector<8x128xf32>
    %31 = arith.mulf %29, %30 : vector<8x128xf32>
    %32 = vector.broadcast %7 : vector<1x128xf32> to vector<8x128xf32>
    %33 = arith.addf %31, %32 : vector<8x128xf32>
    %cst_16 = arith.constant 1.000000e-01 : f32
    %34 = vector.broadcast %cst_16 : f32 to vector<8x128xf32>
    %35 = arith.mulf %34, %33 : vector<8x128xf32>
    %36 = arith.maximumf %33, %35 : vector<8x128xf32>
    %c0_17 = arith.constant 0 : index
    %c0_18 = arith.constant 0 : index
    %37 = vector.load %arg6[%c0_17, %c0_18] : memref<8x128xf32, #tpu.memory_space<vmem>>, vector<8x128xf32>
    tpu.vector_store %arg6[%c0_17, %c0_18], %36 {strides = array<i32>} : memref<8x128xf32, #tpu.memory_space<vmem>>, vector<8x128xf32>,
    return
  }
  func.func @transform_0(%arg0: i32) -> (i32, i32) {
    %c0_i32 = arith.constant 0 : i32
    %c0_i32_0 = arith.constant 0 : i32
    return %arg0, %c0_i32 : i32, i32
  }
  func.func @transform_1(%arg0: i32) -> (i32, i32) {
    %c0_i32 = arith.constant 0 : i32
    %c0_i32_0 = arith.constant 0 : i32
    %c0_i32_1 = arith.constant 0 : i32
    return %c0_i32, %c0_i32_0 : i32, i32
  }
  func.func @transform_2(%arg0: i32) -> (i32, i32) {
    %c0_i32 = arith.constant 0 : i32
    %c0_i32_0 = arith.constant 0 : i32
    %c0_i32_1 = arith.constant 0 : i32
    return %c0_i32, %c0_i32_0 : i32, i32
  }
  func.func @transform_3(%arg0: i32) -> (i32, i32) {
    %c0_i32 = arith.constant 0 : i32
    %c0_i32_0 = arith.constant 0 : i32
    %c0_i32_1 = arith.constant 0 : i32
    return %c0_i32, %c0_i32_0 : i32, i32
  }
  func.func @transform_4(%arg0: i32) -> (i32, i32) {
    %c0_i32 = arith.constant 0 : i32
    %c0_i32_0 = arith.constant 0 : i32
    %c0_i32_1 = arith.constant 0 : i32
    return %c0_i32, %c0_i32_0 : i32, i32
  }
  func.func @transform_5(%arg0: i32) -> (i32, i32) {
    %c0_i32 = arith.constant 0 : i32
    %c0_i32_0 = arith.constant 0 : i32
    return %arg0, %c0_i32 : i32, i32
  }
}

module attributes {stable_mosaic.version = 11 : i64} {
  func.func @_mlp_resident_kernel(%arg0: i32, %arg1: memref<8x16xf32, #tpu.memory_space<vmem>>, %arg2: memref<16x128xf32, #tpu.memory_space<vmem>>, %arg3: memref<1x128xf32, #tpu.memory_space<vmem>>, %arg4: memref<1x128xf32, #tpu.memory_space<vmem>>, %arg5: memref<1x128xf32, #tpu.memory_space<vmem>>, %arg6: memref<8x128xf32, #tpu.memory_space<vmem>>) attributes {dimension_semantics = [#tpu.dimension_semantics<parallel>], iteration_bounds = array<i64: 1>, scalar_prefetch = 0 : i64, scratch_operands = 0 : i64, tpu.core_type = #tpu.core_type<tc>, window_params = [{transform_indices = @transform_0, window_bounds = array<i64: 8, 16>}, {pipeline_mode = #tpu.pipeline_mode<synchronous>, transform_indices = @transform_1, window_bounds = array<i64: 16, 128>}, {pipeline_mode = #tpu.pipeline_mode<synchronous>, transform_indices = @transform_2, window_bounds = array<i64: 1, 128>}, {pipeline_mode = #tpu.pipeline_mode<synchronous>, transform_indices = @transform_3, window_bounds = array<i64: 1, 128>}, {pipeline_mode = #tpu.pipeline_mode<synchronous>, transform_indices = @transform_4, window_bounds = array<i64: 1, 128>}, {transform_indices = @transform_5, window_bounds = array<i64: 8, 128>}]} {
    %c0 = arith.constant 0 : index
    %c0_0 = arith.constant 0 : index
    %0 = vector.load %arg1[%c0, %c0_0] : memref<8x16xf32, #tpu.memory_space<vmem>>, vector<8x16xf32>
    %c0_1 = arith.constant 0 : index
    %c0_2 = arith.constant 0 : index
    %1 = vector.load %arg2[%c0_1, %c0_2] : memref<16x128xf32, #tpu.memory_space<vmem>>, vector<16x128xf32>
    %cst = arith.constant dense<0.000000e+00> : vector<8x128xf32>
    %2 = tpu.matmul %0, %1, %cst {dimension_numbers = #tpu.dot_dimension_numbers<[1], [0], [0], [1], [0, 0, 1, 1], [], []>} : vector<8x16xf32>, vector<16x128xf32>, vector<8x128xf32> -> vector<8x128xf32>
    %c0_3 = arith.constant 0 : index
    %c0_4 = arith.constant 0 : index
    %3 = vector.load %arg3[%c0_3, %c0_4] : memref<1x128xf32, #tpu.memory_space<vmem>>, vector<1x128xf32>
    %4 = vector.broadcast %3 : vector<1x128xf32> to vector<8x128xf32>
    %5 = arith.addf %2, %4 : vector<8x128xf32>
    %c0_5 = arith.constant 0 : index
    %c0_6 = arith.constant 0 : index
    %6 = vector.load %arg4[%c0_5, %c0_6] : memref<1x128xf32, #tpu.memory_space<vmem>>, vector<1x128xf32>
    %c0_7 = arith.constant 0 : index
    %c0_8 = arith.constant 0 : index
    %7 = vector.load %arg5[%c0_7, %c0_8] : memref<1x128xf32, #tpu.memory_space<vmem>>, vector<1x128xf32>
    %cst_9 = arith.constant dense<0.000000e+00> : vector<8xf32>
    %8 = vector.multi_reduction <add>, %5, %cst_9 [1] : vector<8x128xf32> to vector<8xf32>
    %9 = vector.shape_cast %8 : vector<8xf32> to vector<8x1xf32>
    %cst_10 = arith.constant 3.125000e-02 : f32
    %10 = vector.broadcast %cst_10 : f32 to vector<8x1xf32>
    %11 = arith.mulf %9, %10 : vector<8x1xf32>
    %12 = vector.broadcast %11 : vector<8x1xf32> to vector<8x128xf32>
    %13 = arith.subf %5, %12 : vector<8x128xf32>
    %14 = arith.mulf %13, %13 : vector<8x128xf32>
    %cst_11 = arith.constant dense<0.000000e+00> : vector<8xf32>
    %15 = vector.multi_reduction <add>, %14, %cst_11 [1] : vector<8x128xf32> to vector<8xf32>
    %16 = vector.shape_cast %15 : vector<8xf32> to vector<8x1xf32>
    %17 = arith.mulf %11, %11 : vector<8x1xf32>
    %cst_12 = arith.constant 9.600000e+01 : f32
    %18 = vector.broadcast %cst_12 : f32 to vector<8x1xf32>
    %19 = arith.mulf %18, %17 : vector<8x1xf32>
    %20 = arith.subf %16, %19 : vector<8x1xf32>
    %cst_13 = arith.constant 3.125000e-02 : f32
    %21 = vector.broadcast %cst_13 : f32 to vector<8x1xf32>
    %22 = arith.mulf %20, %21 : vector<8x1xf32>
    %cst_14 = arith.constant 0.000000e+00 : f32
    %23 = vector.broadcast %cst_14 : f32 to vector<8x1xf32>
    %24 = arith.maximumf %22, %23 : vector<8x1xf32>
    %cst_15 = arith.constant 9.99999974E-6 : f32
    %25 = vector.broadcast %cst_15 : f32 to vector<8x1xf32>
    %26 = arith.addf %24, %25 : vector<8x1xf32>
    %27 = math.rsqrt %26 : vector<8x1xf32>
    %28 = vector.broadcast %27 : vector<8x1xf32> to vector<8x128xf32>
    %29 = arith.mulf %13, %28 : vector<8x128xf32>
    %30 = vector.broadcast %6 : vector<1x128xf32> to vector<8x128xf32>
    %31 = arith.mulf %29, %30 : vector<8x128xf32>
    %32 = vector.broadcast %7 : vector<1x128xf32> to vector<8x128xf32>
    %33 = arith.addf %31, %32 : vector<8x128xf32>
    %cst_16 = arith.constant 1.000000e-01 : f32
    %34 = vector.broadcast %cst_16 : f32 to vector<8x128xf32>
    %35 = arith.mulf %34, %33 : vector<8x128xf32>
    %36 = arith.maximumf %33, %35 : vector<8x128xf32>
    %c0_17 = arith.constant 0 : index
    %c0_18 = arith.constant 0 : index
    %37 = vector.load %arg6[%c0_17, %c0_18] : memref<8x128xf32, #tpu.memory_space<vmem>>, vector<8x128xf32>
    tpu.vector_store %arg6[%c0_17, %c0_18], %36 {strides = array<i32>} : memref<8x128xf32, #tpu.memory_space<vmem>>, vector<8x128xf32>,
    return
  }
  func.func @transform_0(%arg0: i32) -> (i32, i32) {
    %c0_i32 = arith.constant 0 : i32
    %c0_i32_0 = arith.constant 0 : i32
    return %arg0, %c0_i32 : i32, i32
  }
  func.func @transform_1(%arg0: i32) -> (i32, i32) {
    %c0_i32 = arith.constant 0 : i32
    %c0_i32_0 = arith.constant 0 : i32
    %c0_i32_1 = arith.constant 0 : i32
    return %c0_i32, %c0_i32_0 : i32, i32
  }
  func.func @transform_2(%arg0: i32) -> (i32, i32) {
    %c0_i32 = arith.constant 0 : i32
    %c0_i32_0 = arith.constant 0 : i32
    %c0_i32_1 = arith.constant 0 : i32
    return %c0_i32, %c0_i32_0 : i32, i32
  }
  func.func @transform_3(%arg0: i32) -> (i32, i32) {
    %c0_i32 = arith.constant 0 : i32
    %c0_i32_0 = arith.constant 0 : i32
    %c0_i32_1 = arith.constant 0 : i32
    return %c0_i32, %c0_i32_0 : i32, i32
  }
  func.func @transform_4(%arg0: i32) -> (i32, i32) {
    %c0_i32 = arith.constant 0 : i32
    %c0_i32_0 = arith.constant 0 : i32
    %c0_i32_1 = arith.constant 0 : i32
    return %c0_i32, %c0_i32_0 : i32, i32
  }
  func.func @transform_5(%arg0: i32) -> (i32, i32) {
    %c0_i32 = arith.constant 0 : i32
    %c0_i32_0 = arith.constant 0 : i32
    return %arg0, %c0_i32 : i32, i32
  }
}

</mosaic_0001>

<bundles_post_ra>
// kernel: tpu_custom_call.1
= control target key start
LH: loop header
LB: loop body
LE: loop exit
PB: predicated region body
PF: predicated region fallthrough
CT: control target
= control target key end

     0   :  { %10 = vsyncpa [#allocation3], 0  ;;  %s370_s0 = inlined_call_operand.hbm [shape: f32[8,16], index: 0, kind: input, shape index: {}]   ;;  %s371_s1 = inlined_call_operand.hbm [shape: f32[16,128], index: 1, kind: input, shape index: {}]   ;;  %s372_s2 = inlined_call_operand.vmem [shape: f32[1,128], index: 2, kind: input, shape index: {}]   ;;  %s373_s3 = inlined_call_operand.vmem [shape: f32[1,128], index: 3, kind: input, shape index: {}]   ;;  %s374_s4 = inlined_call_operand.vmem [shape: f32[1,128], index: 4, kind: input, shape index: {}]   ;;  %s375_s5 = inlined_call_operand.hbm [shape: f32[8,128], index: 5, kind: output, shape index: {}]  }
   0x1   :  { %11 = vsyncpa [#allocation6], 0 }
   0x2   :  { %12 = vsyncpa [#allocation4], 0  ;;  %s280_s18 = smov [#allocation2]   ;;  %s281_s20 = smov [#allocation5]  }
   0x3   :  { %s19_s19 = sshll.u32 %s280_s18, 4  ;;  %s28_s21 = sshll.u32 %s281_s20, 4  ;;  %s20_s19 = int_to_ptr.vmem [resolvable:$true] %s19_s19  ;;  %s318_s21 = int_to_ptr.vmem [resolvable:$true] %s28_s21 }
   0x4   :  { %s208_s24 = scalar_lea.hbm %s370_s0, 128 }
   0x5   :  { %p209_p0 = scmp.ne.s32.totalorder %s370_s0, %s208_s24  ;;  %p212_p1 = scmp.lt.u32.totalorder %s208_s24, %s370_s0 }
   0x7   :  { %p214_p2 = pnand %p212_p1, %p209_p0 }
   0x9   :  { %217 = shalt.err (!%p214_p2)
}
   0xa   :  { %s218_s29 = scalar_lea.vmem %s20_s19, 128  ;;  %p223_p4 = scmp.lt.s32.totalorder %s20_s19, %s20_s19 }
   0xb   :  { %p219_p3 = scmp.ne.s32.totalorder %s20_s19, %s218_s29  ;;  %p224_p5 = scmp.lt.s32.totalorder %s218_s29, %s218_s29 }
   0xd   :  { %p225_p6 = por %p224_p5, %p223_p4 }
   0xf   :  { %p226_p7 = pnand %p225_p6, %p219_p3 }
  0x11   :  { %229 = shalt.err (!%p226_p7)
}
  0x12   :  { %22 = dma.hbm_to_vmem [thread:$0]  %s370_s0, 128, %s20_s19, [#allocation3]  }
  0x13   :  { %s230_s9 = scalar_lea.hbm %s371_s1, 256 }
  0x14   :  { %p231_p8 = scmp.ne.s32.totalorder %s371_s1, %s230_s9  ;;  %p234_p9 = scmp.lt.u32.totalorder %s230_s9, %s371_s1 }
  0x16   :  { %p236_p10 = pnand %p234_p9, %p231_p8 }
  0x18   :  { %239 = shalt.err (!%p236_p10)
}
  0x19   :  { %s240_s14 = scalar_lea.vmem %s318_s21, 256  ;;  %p245_p12 = scmp.lt.s32.totalorder %s318_s21, %s318_s21 }
  0x1a   :  { %p241_p11 = scmp.ne.s32.totalorder %s318_s21, %s240_s14  ;;  %p246_p13 = scmp.lt.s32.totalorder %s240_s14, %s240_s14 }
  0x1c   :  { %p247_p0 = por %p246_p13, %p245_p12 }
  0x1e   :  { %p248_p1 = pnand %p247_p0, %p241_p11 }
  0x20   :  { %251 = shalt.err (!%p248_p1)
}
  0x21   :  { %s282_s0 = smov 128   ;;  %s283_s15 = smov 8  }
  0x22   :  { %34 = dma.hbm_to_vmem [thread:$0]  %s371_s1, 256, %s318_s21, [#allocation6], %s282_s0, %s282_s0, %s283_s15  }
  0x23   :  { %274 = dma.done.wait [#allocation3], 128  }
  0x24   :  { %275 = vsyncadd [#allocation3], 4294967168 }
  0x25   :  { %276 = dma.done.wait [#allocation6], 256  }
  0x26   :  { %277 = vsyncadd [#allocation6], 4294967040  ;;  %v284_v0 = vmov 0.0|0.0   ;;  %vm285_vm0 = vmmov 0   ;;  %v286_v1 = vmov 0.0   ;;  %v48_v2 = vld [vmem:[#allocation5] sm:$0xff] }
  0x27   :  { %195 = vmatprep.subr.bf16.mxu0 %v284_v0  ;;  %192 = vmatprep.mubr.msk.f32.mxu0 %vm285_vm0, %v286_v1  ;;  %v49_v3 = vld [vmem:[#allocation5 + $0x8] sm:$0xff]  ;;  %v47_v5 = vld [vmem:[#allocation2] sm:$0xff]  ;;  %vm57_vm1 = vcmask 130048   ;;  %s287_s22 = smov [#allocation7]  }
  0x28   :  { %v196_v4 = vpack.c.bf16 %v49_v3, %v48_v2  ;;  %v181_v6 = vld [vmem:[%s372_s2] ss:$0 sm:$0xff]  ;;  %s171_s23 = sshll.u32 %s287_s22, 4  ;;  %s172_s23 = int_to_ptr.vmem [resolvable:$true] %s171_s23 }
  0x29   :  { %v183_v22 = vld [vmem:[%s373_s3] ss:$0 sm:$0xff]  ;;  %s252_s24 = scalar_lea.vmem %s172_s23, 128  ;;  %p257_p3 = scmp.lt.s32.totalorder %s172_s23, %s172_s23 }
  0x2a   :  { %197 = vmatpush3.bf16.msra.mxu0 %v196_v4  ;;  %v184_v24 = vld [vmem:[%s374_s4] ss:$0 sm:$0xff]  ;;  %p253_p2 = scmp.ne.s32.totalorder %s172_s23, %s252_s24  ;;  %p258_p4 = scmp.lt.s32.totalorder %s252_s24, %s252_s24 }
  0x2c   :  { %p259_p5 = por %p258_p4, %p257_p3 }
  0x2d   :  { %193 = vmatmul.mubr.msk.f32.vlgmr.msra.gmra.mrb[0].mxu0 %vm57_vm1, %v47_v5 }
  0x2e   :  { %p260_p6 = pnand %p259_p5, %p253_p2 }
 0x100   :  { %v127_v7 = vpop.f32.mrb[0].mxu0 }
 0x101   :  { %v128_v8 = vadd.f32 %v181_v6, %v127_v7  ;;  %v194_v9 = vpop.f32.mrb[1].mxu0 }
 0x103   :  { %133 = vadd.xlane.f32.xlu0 %v128_v8 }
 0x190   :  { %v134_v10 = vpop.xlane.xlu0 %133 }
 0x191   :  { %v135_v11 = vmul.f32 0.03125, %v134_v10 }
 0x193   :  { %v136_v12 = vsub.f32 %v128_v8, %v135_v11  ;;  %v140_v14 = vmul.f32 %v135_v11, %v135_v11 }
 0x195   :  { %v137_v13 = vmul.f32 %v136_v12, %v136_v12  ;;  %v141_v15 = vmul.f32 96.0, %v140_v14 }
 0x197   :  { %138 = vadd.xlane.f32.xlu0 %v137_v13 }
 0x224   :  { %v139_v16 = vpop.xlane.xlu0 %138 }
 0x225   :  { %v142_v17 = vsub.f32 %v139_v16, %v141_v15 }
 0x227   :  { %v143_v18 = vmul.f32 0.03125, %v142_v17 }
 0x229   :  { %v144_v19 = vmax.f32 %v143_v18, 0.0 }
 0x22b   :  { %v145_v20 = vadd.f32 1e-05, %v144_v19 }
 0x22d   :  { %206 = vrsqrt.f32 %v145_v20 }
 0x237   :  { %v207_v21 = vpop.eup %206 }
 0x238   :  { %v147_v23 = vmul.f32 %v207_v21, %v136_v12 }
 0x23a   :  { %v154_v25 = vmul.f32 %v183_v22, %v147_v23 }
 0x23c   :  { %v161_v26 = vadd.f32 %v184_v24, %v154_v25 }
 0x23e   :  { %v162_v27 = vmul.f32 0.1, %v161_v26 }
 0x240   :  { %v163_v28 = vmax.f32 %v161_v26, %v162_v27 }
 0x242   :  { %164 = vst [vmem:[#allocation7] sm:$0xff] %v163_v28 }
 0x243   :  { %263 = shalt.err (!%p260_p6)
}
 0x244   :  { %s264_s26 = scalar_lea.hbm %s375_s5, 128 }
 0x245   :  { %p265_p7 = scmp.ne.s32.totalorder %s375_s5, %s264_s26  ;;  %p268_p8 = scmp.lt.u32.totalorder %s264_s26, %s375_s5 }
 0x247   :  { %p270_p9 = pnand %p268_p8, %p265_p7 }
 0x249   :  { %273 = shalt.err (!%p270_p9)
}
 0x24a   :  { %174 = dma.vmem_to_hbm [thread:$0]  %s172_s23, 128, %s375_s5, [#allocation4]  }
 0x24b   :  { %278 = dma.done.wait [#allocation4], 128  }
 0x24c   :  { %279 = vsyncadd [#allocation4], 4294967168 }
 0x24d   :  { %178 = vsyncpa [#allocation3], 1 }
 0x24e   :  { %179 = vsyncpa [#allocation6], 1 }
 0x24f   :  { %180 = vsyncpa [#allocation4], 1 }

// kernel: tpu_custom_call.1
= control target key start
LH: loop header
LB: loop body
LE: loop exit
PB: predicated region body
PF: predicated region fallthrough
CT: control target
= control target key end

     0   :  { %10 = vsyncpa [#allocation3], 0  ;;  %s370_s0 = inlined_call_operand.hbm [shape: f32[8,16], index: 0, kind: input, shape index: {}]   ;;  %s371_s1 = inlined_call_operand.hbm [shape: f32[16,128], index: 1, kind: input, shape index: {}]   ;;  %s372_s2 = inlined_call_operand.vmem [shape: f32[1,128], index: 2, kind: input, shape index: {}]   ;;  %s373_s3 = inlined_call_operand.vmem [shape: f32[1,128], index: 3, kind: input, shape index: {}]   ;;  %s374_s4 = inlined_call_operand.vmem [shape: f32[1,128], index: 4, kind: input, shape index: {}]   ;;  %s375_s5 = inlined_call_operand.hbm [shape: f32[8,128], index: 5, kind: output, shape index: {}]  }
   0x1   :  { %11 = vsyncpa [#allocation6], 0 }
   0x2   :  { %12 = vsyncpa [#allocation4], 0  ;;  %s280_s18 = smov [#allocation2]   ;;  %s281_s20 = smov [#allocation5]  }
   0x3   :  { %s19_s19 = sshll.u32 %s280_s18, 4  ;;  %s28_s21 = sshll.u32 %s281_s20, 4  ;;  %s20_s19 = int_to_ptr.vmem [resolvable:$true] %s19_s19  ;;  %s318_s21 = int_to_ptr.vmem [resolvable:$true] %s28_s21 }
   0x4   :  { %s208_s24 = scalar_lea.hbm %s370_s0, 128 }
   0x5   :  { %p209_p0 = scmp.ne.s32.totalorder %s370_s0, %s208_s24  ;;  %p212_p1 = scmp.lt.u32.totalorder %s208_s24, %s370_s0 }
   0x7   :  { %p214_p2 = pnand %p212_p1, %p209_p0 }
   0x9   :  { %217 = shalt.err (!%p214_p2)
}
   0xa   :  { %s218_s29 = scalar_lea.vmem %s20_s19, 128  ;;  %p223_p4 = scmp.lt.s32.totalorder %s20_s19, %s20_s19 }
   0xb   :  { %p219_p3 = scmp.ne.s32.totalorder %s20_s19, %s218_s29  ;;  %p224_p5 = scmp.lt.s32.totalorder %s218_s29, %s218_s29 }
   0xd   :  { %p225_p6 = por %p224_p5, %p223_p4 }
   0xf   :  { %p226_p7 = pnand %p225_p6, %p219_p3 }
  0x11   :  { %229 = shalt.err (!%p226_p7)
}
  0x12   :  { %22 = dma.hbm_to_vmem [thread:$0]  %s370_s0, 128, %s20_s19, [#allocation3]  }
  0x13   :  { %s230_s9 = scalar_lea.hbm %s371_s1, 256 }
  0x14   :  { %p231_p8 = scmp.ne.s32.totalorder %s371_s1, %s230_s9  ;;  %p234_p9 = scmp.lt.u32.totalorder %s230_s9, %s371_s1 }
  0x16   :  { %p236_p10 = pnand %p234_p9, %p231_p8 }
  0x18   :  { %239 = shalt.err (!%p236_p10)
}
  0x19   :  { %s240_s14 = scalar_lea.vmem %s318_s21, 256  ;;  %p245_p12 = scmp.lt.s32.totalorder %s318_s21, %s318_s21 }
  0x1a   :  { %p241_p11 = scmp.ne.s32.totalorder %s318_s21, %s240_s14  ;;  %p246_p13 = scmp.lt.s32.totalorder %s240_s14, %s240_s14 }
  0x1c   :  { %p247_p0 = por %p246_p13, %p245_p12 }
  0x1e   :  { %p248_p1 = pnand %p247_p0, %p241_p11 }
  0x20   :  { %251 = shalt.err (!%p248_p1)
}
  0x21   :  { %s282_s0 = smov 128   ;;  %s283_s15 = smov 8  }
  0x22   :  { %34 = dma.hbm_to_vmem [thread:$0]  %s371_s1, 256, %s318_s21, [#allocation6], %s282_s0, %s282_s0, %s283_s15  }
  0x23   :  { %274 = dma.done.wait [#allocation3], 128  }
  0x24   :  { %275 = vsyncadd [#allocation3], 4294967168 }
  0x25   :  { %276 = dma.done.wait [#allocation6], 256  }
  0x26   :  { %277 = vsyncadd [#allocation6], 4294967040  ;;  %v284_v0 = vmov 0.0|0.0   ;;  %vm285_vm0 = vmmov 0   ;;  %v286_v1 = vmov 0.0   ;;  %v48_v2 = vld [vmem:[#allocation5] sm:$0xff] }
  0x27   :  { %195 = vmatprep.subr.bf16.mxu0 %v284_v0  ;;  %192 = vmatprep.mubr.msk.f32.mxu0 %vm285_vm0, %v286_v1  ;;  %v49_v3 = vld [vmem:[#allocation5 + $0x8] sm:$0xff]  ;;  %v47_v5 = vld [vmem:[#allocation2] sm:$0xff]  ;;  %vm57_vm1 = vcmask 130048   ;;  %s287_s22 = smov [#allocation7]  }
  0x28   :  { %v196_v4 = vpack.c.bf16 %v49_v3, %v48_v2  ;;  %v181_v6 = vld [vmem:[%s372_s2] ss:$0 sm:$0xff]  ;;  %s171_s23 = sshll.u32 %s287_s22, 4  ;;  %s172_s23 = int_to_ptr.vmem [resolvable:$true] %s171_s23 }
  0x29   :  { %v183_v22 = vld [vmem:[%s373_s3] ss:$0 sm:$0xff]  ;;  %s252_s24 = scalar_lea.vmem %s172_s23, 128  ;;  %p257_p3 = scmp.lt.s32.totalorder %s172_s23, %s172_s23 }
  0x2a   :  { %197 = vmatpush3.bf16.msra.mxu0 %v196_v4  ;;  %v184_v24 = vld [vmem:[%s374_s4] ss:$0 sm:$0xff]  ;;  %p253_p2 = scmp.ne.s32.totalorder %s172_s23, %s252_s24  ;;  %p258_p4 = scmp.lt.s32.totalorder %s252_s24, %s252_s24 }
  0x2c   :  { %p259_p5 = por %p258_p4, %p257_p3 }
  0x2d   :  { %193 = vmatmul.mubr.msk.f32.vlgmr.msra.gmra.mrb[0].mxu0 %vm57_vm1, %v47_v5 }
  0x2e   :  { %p260_p6 = pnand %p259_p5, %p253_p2 }
 0x100   :  { %v127_v7 = vpop.f32.mrb[0].mxu0 }
 0x101   :  { %v128_v8 = vadd.f32 %v181_v6, %v127_v7  ;;  %v194_v9 = vpop.f32.mrb[1].mxu0 }
 0x103   :  { %133 = vadd.xlane.f32.xlu0 %v128_v8 }
 0x190   :  { %v134_v10 = vpop.xlane.xlu0 %133 }
 0x191   :  { %v135_v11 = vmul.f32 0.03125, %v134_v10 }
 0x193   :  { %v136_v12 = vsub.f32 %v128_v8, %v135_v11  ;;  %v140_v14 = vmul.f32 %v135_v11, %v135_v11 }
 0x195   :  { %v137_v13 = vmul.f32 %v136_v12, %v136_v12  ;;  %v141_v15 = vmul.f32 96.0, %v140_v14 }
 0x197   :  { %138 = vadd.xlane.f32.xlu0 %v137_v13 }
 0x224   :  { %v139_v16 = vpop.xlane.xlu0 %138 }
 0x225   :  { %v142_v17 = vsub.f32 %v139_v16, %v141_v15 }
 0x227   :  { %v143_v18 = vmul.f32 0.03125, %v142_v17 }
 0x229   :  { %v144_v19 = vmax.f32 %v143_v18, 0.0 }
 0x22b   :  { %v145_v20 = vadd.f32 1e-05, %v144_v19 }
 0x22d   :  { %206 = vrsqrt.f32 %v145_v20 }
 0x237   :  { %v207_v21 = vpop.eup %206 }
 0x238   :  { %v147_v23 = vmul.f32 %v207_v21, %v136_v12 }
 0x23a   :  { %v154_v25 = vmul.f32 %v183_v22, %v147_v23 }
 0x23c   :  { %v161_v26 = vadd.f32 %v184_v24, %v154_v25 }
 0x23e   :  { %v162_v27 = vmul.f32 0.1, %v161_v26 }
 0x240   :  { %v163_v28 = vmax.f32 %v161_v26, %v162_v27 }
 0x242   :  { %164 = vst [vmem:[#allocation7] sm:$0xff] %v163_v28 }
 0x243   :  { %263 = shalt.err (!%p260_p6)
}
 0x244   :  { %s264_s26 = scalar_lea.hbm %s375_s5, 128 }
 0x245   :  { %p265_p7 = scmp.ne.s32.totalorder %s375_s5, %s264_s26  ;;  %p268_p8 = scmp.lt.u32.totalorder %s264_s26, %s375_s5 }
 0x247   :  { %p270_p9 = pnand %p268_p8, %p265_p7 }
 0x249   :  { %273 = shalt.err (!%p270_p9)
}
 0x24a   :  { %174 = dma.vmem_to_hbm [thread:$0]  %s172_s23, 128, %s375_s5, [#allocation4]  }
 0x24b   :  { %278 = dma.done.wait [#allocation4], 128  }
 0x24c   :  { %279 = vsyncadd [#allocation4], 4294967168 }
 0x24d   :  { %178 = vsyncpa [#allocation3], 1 }
 0x24e   :  { %179 = vsyncpa [#allocation6], 1 }
 0x24f   :  { %180 = vsyncpa [#allocation4], 1 }

</bundles_post_ra>
